<compile_context>
chip_gen: v7x
topology: tpu7x:2x2x1
jax: 0.10.0
libtpu: 0.0.40
codegen_flags: <defaults>
</compile_context>

<pallas_src>
import numpy as np
import jax
import jax.numpy as jnp
from jax.experimental import pallas as pl
from jax.experimental.pallas import tpu as pltpu


def _round_up(x: int, m: int) -> int:
    return ((x + m - 1) // m) * m


def _cdiv(x: int, m: int) -> int:
    return (x + m - 1) // m


def _to_homogeneous_kernel(x_ref, o_ref):
    # x_ref: (D, TM) lane-dense tile of Euclidean points.
    # o_ref: (D+1, TM): rows 0..D-1 = copy of input, row D = 1.0.
    d = x_ref.shape[0]
    o_ref[:d, :] = x_ref[...]
    o_ref[d:, :] = jnp.ones((1, o_ref.shape[1]), dtype=o_ref.dtype)


def convert_points_to_homogeneous_slab(x, *, lane_tile: int = 262144,
                                       min_grid_steps: int = 4):
    """Lane-dense fusion contract: (D, M) slab -> (D+1, M) slab.

    This is the form intended for fusion into larger Pallas pipelines (no
    relayout).  No padding of M is required: the ragged last block is masked
    by Pallas.
    """
    D = int(x.shape[0])
    M = int(x.shape[1])

    # Lane tile: multiple of 128, at most lane_tile, and capped so the grid
    # has >= min_grid_steps steps (keeps both v7x TensorCores busy via the
    # "parallel" grid axis).  Harmless on single-TC v5e/v6e.
    tm = min(lane_tile, max(128, _round_up(_cdiv(M, min_grid_steps), 128)))
    grid = (pl.cdiv(M, tm),)

    return pl.pallas_call(
        _to_homogeneous_kernel,
        out_shape=jax.ShapeDtypeStruct((D + 1, M), x.dtype),
        grid_spec=pltpu.PrefetchScalarGridSpec(
            num_scalar_prefetch=0,
            grid=grid,
            # Sublane dim equals the full array dim (legal for any D); lane
            # dim is a multiple of 128 -> dense stores except the masked
            # ragged tail block.
            in_specs=[pl.BlockSpec((D, tm), lambda i: (0, i))],
            out_specs=pl.BlockSpec((D + 1, tm), lambda i: (0, i)),
        ),
        compiler_params=pltpu.CompilerParams(
            dimension_semantics=("parallel",),
            # 262144-lane f32 tiles double-buffered are ~14 MiB; raise the
            # scoped-VMEM limit so this is safe on v5e (16 MiB default) and
            # comfortably within v6e/v7x budgets.
            vmem_limit_bytes=32 << 20,
        ),
    )(x)


def convert_points_to_homogeneous(points, *, lane_tile: int = 262144):
    """Pallas equivalent of ConvertPointsToHomogeneous.forward (channel-last).

    NOTE: the reshape/transpose to and from the lane-dense slab are
    wrapper-side layout passes; for fused use, call
    `convert_points_to_homogeneous_slab` on an already lane-dense (D, M) slab.
    """
    points = jnp.asarray(points)
    if points.ndim < 2:
        raise ValueError(
            "Input must be at least a 2D tensor. Got {}".format(points.shape)
        )
    orig_shape = points.shape
    D = int(orig_shape[-1])
    M = int(np.prod(orig_shape[:-1]))

    x = points.reshape(M, D).T                      # (D, M) lane-dense slab
    out_t = convert_points_to_homogeneous_slab(x, lane_tile=lane_tile)
    return out_t.T.reshape(orig_shape[:-1] + (D + 1,))


def _reference(points):
    ones = jnp.ones(points.shape[:-1] + (1,), dtype=points.dtype)
    return jnp.concatenate([points, ones], axis=-1)


if __name__ == "__main__":
    key = jax.random.PRNGKey(0)
    k1, k2, k3, k4 = jax.random.split(key, 4)

    # B x N x 3 Euclidean points -> B x N x 4 homogeneous points.
    B, N, D = 2, 4, 3
    pts = jax.random.uniform(k1, (B, N, D), dtype=jnp.float32)
    out = jax.block_until_ready(convert_points_to_homogeneous(pts))
    assert out.shape == (B, N, D + 1), out.shape
    np.testing.assert_allclose(
        np.asarray(out), np.asarray(_reference(pts)), rtol=0, atol=0
    )

    # Ragged case (M = 111, not a multiple of 128) -> exercises the masked
    # last block of the cdiv grid (no wrapper-side padding anymore).
    pts2 = jax.random.uniform(k2, (3, 37, 3), dtype=jnp.float32)
    out2 = jax.block_until_ready(convert_points_to_homogeneous(pts2))
    assert out2.shape == (3, 37, 4), out2.shape
    np.testing.assert_allclose(
        np.asarray(out2), np.asarray(_reference(pts2)), rtol=0, atol=0
    )

    # Multi-step grid with a ragged tail (M = 800, tm = 256 -> 4 blocks,
    # last block half-full) to exercise the megacore-friendly tiling.
    pts3 = jax.random.uniform(k3, (4, 200, 3), dtype=jnp.float32)
    out3 = jax.block_until_ready(convert_points_to_homogeneous(pts3))
    assert out3.shape == (4, 200, 4), out3.shape
    np.testing.assert_allclose(
        np.asarray(out3), np.asarray(_reference(pts3)), rtol=0, atol=0
    )

    # Plain 2D input (D, N) per the module's documented shapes.
    pts4 = jax.random.uniform(k4, (5, 3), dtype=jnp.float32)
    out4 = jax.block_until_ready(convert_points_to_homogeneous(pts4))
    assert out4.shape == (5, 4), out4.shape
    np.testing.assert_allclose(
        np.asarray(out4), np.asarray(_reference(pts4)), rtol=0, atol=0
    )

    print("KERNEL_OK")
</pallas_src>

<mosaic_0001>
module attributes {stable_mosaic.version = 11 : i64} {
  func.func @_to_homogeneous_kernel(%arg0: i32, %arg1: memref<3x128xf32, #tpu.memory_space<vmem>>, %arg2: memref<4x128xf32, #tpu.memory_space<vmem>>) attributes {dimension_semantics = [#tpu.dimension_semantics<parallel>], iteration_bounds = array<i64: 1>, scalar_prefetch = 0 : i64, scratch_operands = 0 : i64, tpu.core_type = #tpu.core_type<tc>, window_params = [{transform_indices = @transform_0, window_bounds = array<i64: 3, 128>}, {transform_indices = @transform_1, window_bounds = array<i64: 4, 128>}]} {
    %c0 = arith.constant 0 : index
    %c0_0 = arith.constant 0 : index
    %0 = vector.load %arg1[%c0, %c0_0] : memref<3x128xf32, #tpu.memory_space<vmem>>, vector<3x128xf32>
    %c0_1 = arith.constant 0 : index
    %c0_2 = arith.constant 0 : index
    %1 = vector.load %arg2[%c0_1, %c0_2] : memref<4x128xf32, #tpu.memory_space<vmem>>, vector<3x128xf32>
    tpu.vector_store %arg2[%c0_1, %c0_2], %0 {strides = array<i32>} : memref<4x128xf32, #tpu.memory_space<vmem>>, vector<3x128xf32>,
    %cst = arith.constant 1.000000e+00 : f32
    %2 = vector.broadcast %cst : f32 to vector<1x128xf32>
    %c3 = arith.constant 3 : index
    %c0_3 = arith.constant 0 : index
    %3 = vector.load %arg2[%c3, %c0_3] : memref<4x128xf32, #tpu.memory_space<vmem>>, vector<1x128xf32>
    tpu.vector_store %arg2[%c3, %c0_3], %2 {strides = array<i32>} : memref<4x128xf32, #tpu.memory_space<vmem>>, vector<1x128xf32>,
    return
  }
  func.func @transform_0(%arg0: i32) -> (i32, i32) {
    %c0_i32 = arith.constant 0 : i32
    %c0_i32_0 = arith.constant 0 : i32
    return %c0_i32, %arg0 : i32, i32
  }
  func.func @transform_1(%arg0: i32) -> (i32, i32) {
    %c0_i32 = arith.constant 0 : i32
    %c0_i32_0 = arith.constant 0 : i32
    return %c0_i32, %arg0 : i32, i32
  }
}

</mosaic_0001>

<bundles_post_ra>
// kernel: tpu_custom_call.1
= control target key start
LH: loop header
LB: loop body
LE: loop exit
PB: predicated region body
PF: predicated region fallthrough
CT: control target
= control target key end

     0   :  { %6 = vsyncpa [#allocation3], 0  ;;  %s127_s0 = inlined_call_operand.hbm [shape: f32[3,8], index: 0, kind: input, shape index: {}]   ;;  %s128_s1 = inlined_call_operand.hbm [shape: f32[4,8], index: 1, kind: output, shape index: {}]  }
   0x1   :  { %7 = vsyncpa [#allocation4], 0  ;;  %s90_s6 = smov [#allocation2]   ;;  %s42_s10 = scalar_lea.hbm %s127_s0, 64 }
   0x2   :  { %s14_s7 = sshll.u32 %s90_s6, 4  ;;  %p43_p0 = scmp.ne.s32.totalorder %s127_s0, %s42_s10  ;;  %s15_s7 = int_to_ptr.vmem [resolvable:$true] %s14_s7 }
   0x3   :  { %p46_p1 = scmp.lt.u32.totalorder %s42_s10, %s127_s0 }
   0x5   :  { %p48_p2 = pnand %p46_p1, %p43_p0 }
   0x7   :  { %51 = shalt.err (!%p48_p2)
}
   0x8   :  { %s52_s15 = scalar_lea.vmem %s15_s7, 64  ;;  %p57_p4 = scmp.lt.s32.totalorder %s15_s7, %s15_s7 }
   0x9   :  { %p53_p3 = scmp.ne.s32.totalorder %s15_s7, %s52_s15  ;;  %p58_p5 = scmp.lt.s32.totalorder %s52_s15, %s52_s15 }
   0xb   :  { %p59_p6 = por %p58_p5, %p57_p4 }
   0xd   :  { %p60_p7 = pnand %p59_p6, %p53_p3 }
   0xf   :  { %63 = shalt.err (!%p60_p7)
}
  0x10   :  { %17 = dma.hbm_to_vmem [thread:$0]  %s127_s0, 64, %s15_s7, [#allocation3]  }
  0x11   :  { %86 = dma.done.wait [#allocation3], 64  }
  0x12   :  { %87 = vsyncadd [#allocation3], 4294967232  ;;  %v91_v0 = vmov 1.0   ;;  %s92_s18 = smov [#allocation5]   ;;  %v21_v1 = vld [vmem:[#allocation2] sm:$0x7] }
  0x13   :  { %23 = vst [vmem:[#allocation5 + $0x3] sm:$0x1] %v91_v0  ;;  %s30_s19 = sshll.u32 %s92_s18, 4  ;;  %22 = vst [vmem:[#allocation5] sm:$0x7] %v21_v1  ;;  %s31_s19 = int_to_ptr.vmem [resolvable:$true] %s30_s19 }
  0x14   :  { %s64_s20 = scalar_lea.vmem %s31_s19, 64  ;;  %p69_p9 = scmp.lt.s32.totalorder %s31_s19, %s31_s19 }
  0x15   :  { %p65_p8 = scmp.ne.s32.totalorder %s31_s19, %s64_s20  ;;  %p70_p10 = scmp.lt.s32.totalorder %s64_s20, %s64_s20 }
  0x17   :  { %p71_p11 = por %p70_p10, %p69_p9 }
  0x19   :  { %p72_p12 = pnand %p71_p11, %p65_p8 }
  0x1b   :  { %75 = shalt.err (!%p72_p12)
}
  0x1c   :  { %s76_s0 = scalar_lea.hbm %s128_s1, 64 }
  0x1d   :  { %p77_p13 = scmp.ne.s32.totalorder %s128_s1, %s76_s0  ;;  %p80_p0 = scmp.lt.u32.totalorder %s76_s0, %s128_s1 }
  0x1f   :  { %p82_p1 = pnand %p80_p0, %p77_p13 }
  0x21   :  { %85 = shalt.err (!%p82_p1)
}
  0x22   :  { %33 = dma.vmem_to_hbm [thread:$0]  %s31_s19, 64, %s128_s1, [#allocation4]  }
  0x23   :  { %88 = dma.done.wait [#allocation4], 64  }
  0x24   :  { %89 = vsyncadd [#allocation4], 4294967232 }
  0x25   :  { %37 = vsyncpa [#allocation3], 1 }
  0x26   :  { %38 = vsyncpa [#allocation4], 1 }

</bundles_post_ra>
